<compile_context>
chip_gen: v6e
topology: v6e:2x2x1
jax: 0.10.0
libtpu: 0.0.40
codegen_flags: <defaults>
</compile_context>

<pallas_src>
import jax
import jax.numpy as jnp
import numpy as np
from jax.experimental import pallas as pl
from jax.experimental.pallas import tpu as pltpu

# --- static configuration (the `param` dict of the module) -------------------
B = 8          # batch (BatchNorm1d in training mode needs > 1)
S = 16         # sequence length
E = 32         # extracter_embed_dim
K = 8          # extracter_kernel_num
KS = 3         # extracter_kernel_size
PAD = 0        # extracter_padding (must be 0 for the forward to be shape-valid)
OUT_DIM = 16   # extracter_out_dim
H1 = S - KS + 1        # 14
H2 = H1 - KS + 1       # 12
SE = S * E             # 512  (flattened input features)
PW = max(K, OUT_DIM)   # 16   (padded feature width used inside the kernel)
BN_EPS = 1e-5

# Parameter-slab row offsets (all multiples of 8 -> sublane-aligned slices).
_ROW_WC = 0                 # rows [0, SE)        : folded conv+pool weight (SE, PW)
_ROW_WL = SE                # rows [SE, SE+PW)    : linear weight (PW, PW), zero-padded
_ROW_BC = SE + PW           # rows [SE+PW, +8)    : row 0 = folded conv bias
_ROW_BL = SE + PW + 8       # rows [SE+PW+8, +8)  : row 0 = linear bias
_SLAB_ROWS = SE + PW + 16   # 544


def extracter_kernel(x_ref, p_ref, o_ref):
    """x_ref: (B, SE) f32, p_ref: (_SLAB_ROWS, PW) f32, o_ref: (B, OUT_DIM) f32."""
    x = x_ref[...]                                        # (B, SE)

    w_comb = p_ref[pl.ds(_ROW_WC, SE), :]                 # (SE, PW)
    w_lin  = p_ref[pl.ds(_ROW_WL, PW), :]                 # (PW, PW)
    b_comb = p_ref[pl.ds(_ROW_BC, 8), :][0:1, :]          # (1, PW)
    b_lin  = p_ref[pl.ds(_ROW_BL, 8), :][0:1, :]          # (1, PW)

    # CONV1 -> permute -> CONV5 -> AdaptiveAvgPool2d((1,1)) folded into ONE matmul.
    pooled = jnp.dot(x, w_comb, preferred_element_type=jnp.float32) + b_comb
    pooled = jnp.maximum(pooled, 0.0)                     # ReLU; padded cols stay 0

    # Fresh BatchNorm1d (training mode): biased batch statistics, gamma=1, beta=0.
    mu  = jnp.mean(pooled, axis=0, keepdims=True)
    var = jnp.mean((pooled - mu) ** 2, axis=0, keepdims=True)
    bn  = (pooled - mu) * jax.lax.rsqrt(var + BN_EPS)

    # MFC: Linear(K, OUT_DIM); padded rows of w_lin are zero, so the zero-padded
    # features contribute nothing.
    y = jnp.dot(bn, w_lin, preferred_element_type=jnp.float32) + b_lin
    o_ref[...] = y[:, 0:OUT_DIM]


def fold_conv_pool(w1, b1, w5, b5):
    """Fold CONV1 -> permute -> CONV5 -> mean-pool into one affine map (host side).

    w1: (KS, E, K)   CONV1 weight, PyTorch (K,1,KS,E) stored as (KS, E, K)
    b1: (K,)
    w5: (KS, K, K)   CONV5 weight, PyTorch (K,1,KS,K) stored as (KS, K_in, K_out);
                     K_in is CONV1's output-channel axis after the permute.
    b5: (K,)
    Returns W: (S*E, K), b: (K,)  with  pooled_pre_relu = x.reshape(B, S*E) @ W + b.
    """
    w1 = np.asarray(w1, np.float64); b1 = np.asarray(b1, np.float64)
    w5 = np.asarray(w5, np.float64); b5 = np.asarray(b5, np.float64)
    W = np.zeros((S, E, K), np.float64)
    for t in range(H2):
        for i in range(KS):
            for i2 in range(KS):
                # coefficient of x[:, t+i+i2, :] in mean-pooled CONV5 output
                W[t + i + i2] += (w1[i2] @ w5[i]) / H2
    b = np.einsum('j,ijk->k', b1, w5) + b5
    return jnp.asarray(W.reshape(SE, K), jnp.float32), jnp.asarray(b, jnp.float32)


def pack_params(w_comb, b_comb, w_lin, b_lin):
    """Pack every parameter into one lane-dense f32 slab (single DMA)."""
    slab = np.zeros((_SLAB_ROWS, PW), np.float32)
    slab[_ROW_WC:_ROW_WC + SE, 0:K] = np.asarray(w_comb, np.float32)
    slab[_ROW_WL:_ROW_WL + K, 0:OUT_DIM] = np.asarray(w_lin, np.float32)
    slab[_ROW_BC, 0:K] = np.asarray(b_comb, np.float32)
    slab[_ROW_BL, 0:OUT_DIM] = np.asarray(b_lin, np.float32)
    return jnp.asarray(slab)


@jax.jit
def extracter_forward(x, slab):
    vmem = pl.BlockSpec(memory_space=pltpu.MemorySpace.VMEM)
    return pl.pallas_call(
        extracter_kernel,
        out_shape=jax.ShapeDtypeStruct((B, OUT_DIM), jnp.float32),
        in_specs=[vmem, vmem],
        out_specs=vmem,
    )(x.reshape(B, SE), slab)


def _pooled_pre_relu_reference(x, w1, b1, w5, b5):
    """Pure-JAX explicit conv-chain reference (pre-ReLU pooled values)."""
    hp = jax.lax.Precision.HIGHEST
    c1 = sum(jnp.einsum('bte,ek->btk', x[:, i:i + H1, :], w1[i], precision=hp)
             for i in range(KS)) + b1[None, None, :]
    c5 = sum(jnp.einsum('btj,jk->btk', c1[:, i:i + H2, :], w5[i], precision=hp)
             for i in range(KS)) + b5[None, None, :]
    return jnp.mean(c5, axis=1)                           # (B, K)


if __name__ == "__main__":
    key = jax.random.PRNGKey(0)
    k_x, k_w1, k_b1, k_w5, k_b5, k_wl, k_bl = jax.random.split(key, 7)

    # Deterministic synthetic parameters (shapes follow the module's __init__).
    x  = jax.random.normal(k_x,  (B, S, E), jnp.float32)
    w1 = jax.random.normal(k_w1, (KS, E, K), jnp.float32) * (1.0 / jnp.sqrt(KS * E))
    b1 = jax.random.normal(k_b1, (K,), jnp.float32) * 0.05
    w5 = jax.random.normal(k_w5, (KS, K, K), jnp.float32) * (1.0 / jnp.sqrt(KS * K))
    b5 = jax.random.normal(k_b5, (K,), jnp.float32) * 0.05
    wl = jax.random.normal(k_wl, (K, OUT_DIM), jnp.float32) * (1.0 / jnp.sqrt(K))
    bl = jax.random.normal(k_bl, (OUT_DIM,), jnp.float32) * 0.05

    # --- host-side fold of the linear CONV1 -> CONV5 -> pool chain ---------------
    w_comb, b_comb = fold_conv_pool(w1, b1, w5, b5)

    # Validate the fold against the explicit conv-chain reference (re-associated
    # sums -> tolerance-based check, not exact equality).
    pooled_fold = (jnp.dot(x.reshape(B, SE), w_comb,
                           precision=jax.lax.Precision.HIGHEST) + b_comb[None, :])
    pooled_ref = _pooled_pre_relu_reference(x, w1, b1, w5, b5)
    np.testing.assert_allclose(np.asarray(pooled_fold), np.asarray(pooled_ref),
                               rtol=1e-3, atol=1e-3)

    slab = pack_params(w_comb, b_comb, wl, bl)

    out = extracter_forward(x, slab)
    out = jax.block_until_ready(out)
    assert out.shape == (B, OUT_DIM) and out.dtype == jnp.float32
    assert bool(jnp.all(jnp.isfinite(out)))
    print("KERNEL_OK")
</pallas_src>

<mosaic_0001>
module attributes {stable_mosaic.version = 11 : i64} {
  func.func @extracter_kernel(%arg0: memref<8x512xf32, #tpu.memory_space<vmem>>, %arg1: memref<544x16xf32, #tpu.memory_space<vmem>>, %arg2: memref<8x16xf32, #tpu.memory_space<vmem>>) attributes {dimension_semantics = [], scalar_prefetch = 0 : i64, scratch_operands = 0 : i64, tpu.core_type = #tpu.core_type<tc>} {
    %c0 = arith.constant 0 : index
    %c0_0 = arith.constant 0 : index
    %0 = vector.load %arg0[%c0, %c0_0] : memref<8x512xf32, #tpu.memory_space<vmem>>, vector<8x512xf32>
    %c0_1 = arith.constant 0 : index
    %c0_2 = arith.constant 0 : index
    %1 = vector.load %arg1[%c0_1, %c0_2] : memref<544x16xf32, #tpu.memory_space<vmem>>, vector<512x16xf32>
    %c512 = arith.constant 512 : index
    %c0_3 = arith.constant 0 : index
    %2 = vector.load %arg1[%c512, %c0_3] : memref<544x16xf32, #tpu.memory_space<vmem>>, vector<16x16xf32>
    %c528 = arith.constant 528 : index
    %c0_4 = arith.constant 0 : index
    %3 = vector.load %arg1[%c528, %c0_4] : memref<544x16xf32, #tpu.memory_space<vmem>>, vector<8x16xf32>
    %4 = vector.extract_strided_slice %3 {offsets = [0, 0], sizes = [1, 16], strides = [1, 1]} : vector<8x16xf32> to vector<1x16xf32>
    %c536 = arith.constant 536 : index
    %c0_5 = arith.constant 0 : index
    %5 = vector.load %arg1[%c536, %c0_5] : memref<544x16xf32, #tpu.memory_space<vmem>>, vector<8x16xf32>
    %6 = vector.extract_strided_slice %5 {offsets = [0, 0], sizes = [1, 16], strides = [1, 1]} : vector<8x16xf32> to vector<1x16xf32>
    %cst = arith.constant dense<0.000000e+00> : vector<8x16xf32>
    %7 = tpu.matmul %0, %1, %cst {dimension_numbers = #tpu.dot_dimension_numbers<[1], [0], [0], [1], [0, 0, 1, 1], [], []>} : vector<8x512xf32>, vector<512x16xf32>, vector<8x16xf32> -> vector<8x16xf32>
    %8 = vector.broadcast %4 : vector<1x16xf32> to vector<8x16xf32>
    %9 = arith.addf %7, %8 : vector<8x16xf32>
    %cst_6 = arith.constant 0.000000e+00 : f32
    %10 = vector.broadcast %cst_6 : f32 to vector<8x16xf32>
    %11 = arith.maximumf %9, %10 : vector<8x16xf32>
    %cst_7 = arith.constant dense<0.000000e+00> : vector<16xf32>
    %12 = vector.multi_reduction <add>, %11, %cst_7 [0] : vector<8x16xf32> to vector<16xf32>
    %13 = vector.shape_cast %12 : vector<16xf32> to vector<1x16xf32>
    %cst_8 = arith.constant 8.000000e+00 : f32
    %14 = vector.broadcast %cst_8 : f32 to vector<1x16xf32>
    %15 = arith.divf %13, %14 : vector<1x16xf32>
    %16 = vector.broadcast %15 : vector<1x16xf32> to vector<8x16xf32>
    %17 = arith.subf %11, %16 : vector<8x16xf32>
    %18 = arith.mulf %17, %17 : vector<8x16xf32>
    %cst_9 = arith.constant dense<0.000000e+00> : vector<16xf32>
    %19 = vector.multi_reduction <add>, %18, %cst_9 [0] : vector<8x16xf32> to vector<16xf32>
    %20 = vector.shape_cast %19 : vector<16xf32> to vector<1x16xf32>
    %cst_10 = arith.constant 8.000000e+00 : f32
    %21 = vector.broadcast %cst_10 : f32 to vector<1x16xf32>
    %22 = arith.divf %20, %21 : vector<1x16xf32>
    %23 = vector.broadcast %15 : vector<1x16xf32> to vector<8x16xf32>
    %24 = arith.subf %11, %23 : vector<8x16xf32>
    %cst_11 = arith.constant 9.99999974E-6 : f32
    %25 = vector.broadcast %cst_11 : f32 to vector<1x16xf32>
    %26 = arith.addf %22, %25 : vector<1x16xf32>
    %27 = math.rsqrt %26 : vector<1x16xf32>
    %28 = vector.broadcast %27 : vector<1x16xf32> to vector<8x16xf32>
    %29 = arith.mulf %24, %28 : vector<8x16xf32>
    %cst_12 = arith.constant dense<0.000000e+00> : vector<8x16xf32>
    %30 = tpu.matmul %29, %2, %cst_12 {dimension_numbers = #tpu.dot_dimension_numbers<[1], [0], [0], [1], [0, 0, 1, 1], [], []>} : vector<8x16xf32>, vector<16x16xf32>, vector<8x16xf32> -> vector<8x16xf32>
    %31 = vector.broadcast %6 : vector<1x16xf32> to vector<8x16xf32>
    %32 = arith.addf %30, %31 : vector<8x16xf32>
    %c0_13 = arith.constant 0 : index
    %c0_14 = arith.constant 0 : index
    %33 = vector.load %arg2[%c0_13, %c0_14] : memref<8x16xf32, #tpu.memory_space<vmem>>, vector<8x16xf32>
    tpu.vector_store %arg2[%c0_13, %c0_14], %32 {strides = array<i32>} : memref<8x16xf32, #tpu.memory_space<vmem>>, vector<8x16xf32>,
    return
  }
}

</mosaic_0001>

<bundles_post_ra>
// kernel: extracter_forward.1
= control target key start
LH: loop header
LB: loop body
LE: loop exit
PB: predicated region body
PF: predicated region fallthrough
CT: control target
= control target key end

     0   :  { %s693_s0 = inlined_call_operand.vmem [shape: f32[8,512], index: 0, kind: input, shape index: {}]   ;;  %s694_s1 = inlined_call_operand.vmem [shape: f32[544,16], index: 1, kind: input, shape index: {}]   ;;  %s695_s2 = inlined_call_operand.hbm [shape: f32[8,16], index: 2, kind: output, shape index: {}]  }
   0x1   :  { %v47_v0 = vld [vmem:[%s694_s1 + $0xf8] sm:$0xff]  ;;  %v46_v4 = vld [vmem:[%s694_s1 + $0xf0] sm:$0xff]  ;;  %v45_v8 = vld [vmem:[%s694_s1 + $0xe8] sm:$0xff] }
   0x2   :  { %v79_v1 = vld [vmem:[%s694_s1 + $0x1f8] sm:$0xff]  ;;  %345 = vmatprep.subr.mxu0 %v47_v0  ;;  %v78_v5 = vld [vmem:[%s694_s1 + $0x1f0] sm:$0xff]  ;;  %v77_v9 = vld [vmem:[%s694_s1 + $0x1e8] sm:$0xff] }
   0x3   :  { %v31_v2 = vld [vmem:[%s694_s1 + $0x78] sm:$0xff]  ;;  %380 = vmatprep.subr.mxu1 %v79_v1  ;;  %v30_v6 = vld [vmem:[%s694_s1 + $0x70] sm:$0xff]  ;;  %v29_v10 = vld [vmem:[%s694_s1 + $0x68] sm:$0xff] }
   0x4   :  { %v63_v3 = vld [vmem:[%s694_s1 + $0x178] sm:$0xff]  ;;  %346 = vmatpush3.msra.mxu0 %v31_v2  ;;  %v62_v7 = vld [vmem:[%s694_s1 + $0x170] sm:$0xff]  ;;  %v61_v11 = vld [vmem:[%s694_s1 + $0x168] sm:$0xff] }
   0x5   :  { %381 = vmatpush3.msra.mxu1 %v63_v3  ;;  %347 = vmatprep.subr.mxu0 %v46_v4  ;;  %v44_v12 = vld [vmem:[%s694_s1 + $0xe0] sm:$0xff]  ;;  %v43_v16 = vld [vmem:[%s694_s1 + $0xd8] sm:$0xff]  ;;  %v42_v20 = vld [vmem:[%s694_s1 + $0xd0] sm:$0xff] }
   0x6   :  { %382 = vmatprep.subr.mxu1 %v78_v5  ;;  %348 = vmatpush3.msra.mxu0 %v30_v6  ;;  %v76_v13 = vld [vmem:[%s694_s1 + $0x1e0] sm:$0xff]  ;;  %v75_v17 = vld [vmem:[%s694_s1 + $0x1d8] sm:$0xff]  ;;  %v74_v21 = vld [vmem:[%s694_s1 + $0x1d0] sm:$0xff] }
   0x7   :  { %383 = vmatpush3.msra.mxu1 %v62_v7  ;;  %349 = vmatprep.subr.mxu0 %v45_v8  ;;  %v28_v14 = vld [vmem:[%s694_s1 + $0x60] sm:$0xff]  ;;  %v27_v18 = vld [vmem:[%s694_s1 + $0x58] sm:$0xff]  ;;  %v26_v22 = vld [vmem:[%s694_s1 + $0x50] sm:$0xff] }
   0x8   :  { %384 = vmatprep.subr.mxu1 %v77_v9  ;;  %v60_v15 = vld [vmem:[%s694_s1 + $0x160] sm:$0xff]  ;;  %350 = vmatpush3.msra.mxu0 %v29_v10  ;;  %v59_v19 = vld [vmem:[%s694_s1 + $0x158] sm:$0xff]  ;;  %v58_v23 = vld [vmem:[%s694_s1 + $0x150] sm:$0xff] }
   0x9   :  { %385 = vmatpush3.msra.mxu1 %v61_v11  ;;  %351 = vmatprep.subr.mxu0 %v44_v12  ;;  %v41_v24 = vld [vmem:[%s694_s1 + $0xc8] sm:$0xff]  ;;  %v40_v28 = vld [vmem:[%s694_s1 + $0xc0] sm:$0xff]  ;;  %v39_v32 = vld [vmem:[%s694_s1 + $0xb8] sm:$0xff] }
   0xa   :  { %386 = vmatprep.subr.mxu1 %v76_v13  ;;  %352 = vmatpush3.msra.mxu0 %v28_v14  ;;  %v73_v25 = vld [vmem:[%s694_s1 + $0x1c8] sm:$0xff]  ;;  %v72_v29 = vld [vmem:[%s694_s1 + $0x1c0] sm:$0xff]  ;;  %v71_v33 = vld [vmem:[%s694_s1 + $0x1b8] sm:$0xff] }
   0xb   :  { %387 = vmatpush3.msra.mxu1 %v60_v15  ;;  %353 = vmatprep.subr.mxu0 %v43_v16  ;;  %v25_v26 = vld [vmem:[%s694_s1 + $0x48] sm:$0xff]  ;;  %v24_v30 = vld [vmem:[%s694_s1 + $0x40] sm:$0xff]  ;;  %v23_v34 = vld [vmem:[%s694_s1 + $0x38] sm:$0xff] }
   0xc   :  { %388 = vmatprep.subr.mxu1 %v75_v17  ;;  %354 = vmatpush3.msra.mxu0 %v27_v18  ;;  %v57_v27 = vld [vmem:[%s694_s1 + $0x148] sm:$0xff]  ;;  %v56_v31 = vld [vmem:[%s694_s1 + $0x140] sm:$0xff]  ;;  %v55_v35 = vld [vmem:[%s694_s1 + $0x138] sm:$0xff] }
   0xd   :  { %389 = vmatpush3.msra.mxu1 %v59_v19  ;;  %355 = vmatprep.subr.mxu0 %v42_v20  ;;  %v38_v36 = vld [vmem:[%s694_s1 + $0xb0] sm:$0xff]  ;;  %v37_v40 = vld [vmem:[%s694_s1 + $0xa8] sm:$0xff]  ;;  %v36_v44 = vld [vmem:[%s694_s1 + $0xa0] sm:$0xff] }
   0xe   :  { %390 = vmatprep.subr.mxu1 %v74_v21  ;;  %356 = vmatpush3.msra.mxu0 %v26_v22  ;;  %v70_v37 = vld [vmem:[%s694_s1 + $0x1b0] sm:$0xff]  ;;  %v69_v41 = vld [vmem:[%s694_s1 + $0x1a8] sm:$0xff]  ;;  %v68_v45 = vld [vmem:[%s694_s1 + $0x1a0] sm:$0xff] }
   0xf   :  { %391 = vmatpush3.msra.mxu1 %v58_v23  ;;  %357 = vmatprep.subr.mxu0 %v41_v24  ;;  %v22_v38 = vld [vmem:[%s694_s1 + $0x30] sm:$0xff]  ;;  %v21_v42 = vld [vmem:[%s694_s1 + $0x28] sm:$0xff]  ;;  %v20_v46 = vld [vmem:[%s694_s1 + $0x20] sm:$0xff] }
  0x10   :  { %392 = vmatprep.subr.mxu1 %v73_v25  ;;  %358 = vmatpush3.msra.mxu0 %v25_v26  ;;  %v54_v39 = vld [vmem:[%s694_s1 + $0x130] sm:$0xff]  ;;  %v53_v43 = vld [vmem:[%s694_s1 + $0x128] sm:$0xff]  ;;  %v52_v47 = vld [vmem:[%s694_s1 + $0x120] sm:$0xff] }
  0x11   :  { %393 = vmatpush3.msra.mxu1 %v57_v27  ;;  %359 = vmatprep.subr.mxu0 %v40_v28  ;;  %v35_v48 = vld [vmem:[%s694_s1 + $0x98] sm:$0xff] }
  0x12   :  { %394 = vmatprep.subr.mxu1 %v72_v29  ;;  %360 = vmatpush3.msra.mxu0 %v24_v30  ;;  %v67_v49 = vld [vmem:[%s694_s1 + $0x198] sm:$0xff] }
  0x13   :  { %395 = vmatpush3.msra.mxu1 %v56_v31  ;;  %361 = vmatprep.subr.mxu0 %v39_v32 }
  0x14   :  { %396 = vmatprep.subr.mxu1 %v71_v33  ;;  %362 = vmatpush3.msra.mxu0 %v23_v34 }
  0x15   :  { %397 = vmatpush3.msra.mxu1 %v55_v35  ;;  %363 = vmatprep.subr.mxu0 %v38_v36 }
  0x16   :  { %398 = vmatprep.subr.mxu1 %v70_v37  ;;  %364 = vmatpush3.msra.mxu0 %v22_v38 }
  0x17   :  { %399 = vmatpush3.msra.mxu1 %v54_v39  ;;  %365 = vmatprep.subr.mxu0 %v37_v40 }
  0x18   :  { %400 = vmatprep.subr.mxu1 %v69_v41  ;;  %366 = vmatpush3.msra.mxu0 %v21_v42 }
  0x19   :  { %401 = vmatpush3.msra.mxu1 %v53_v43 }
  0x1a   :  { %7 = vsyncpa [#allocation3], 0  ;;  %367 = vmatprep.subr.mxu0 %v36_v44  ;;  %402 = vmatprep.subr.mxu1 %v68_v45  ;;  %v19_v50 = vld [vmem:[%s694_s1 + $0x18] sm:$0xff]  ;;  %v34_v52 = vld [vmem:[%s694_s1 + $0x90] sm:$0xff]  ;;  %v452_v4 = vmov 0.0   ;;  %vm453_vm0 = vmmov 0   ;;  %v84_v7 = vlaneseq }
  0x1b   :  { %v51_v51 = vld [vmem:[%s694_s1 + $0x118] sm:$0xff]  ;;  %368 = vmatpush3.msra.mxu0 %v20_v46  ;;  %403 = vmatpush3.msra.mxu1 %v52_v47  ;;  %v66_v53 = vld [vmem:[%s694_s1 + $0x190] sm:$0xff]  ;;  %v33_v56 = vld [vmem:[%s694_s1 + $0x88] sm:$0xff]  ;;  %vm229_vm1 = vcmask 130048   ;;  %s454_s12 = smov [#allocation2]  }
  0x1c   :  { %369 = vmatprep.subr.mxu0 %v35_v48  ;;  %404 = vmatprep.subr.mxu1 %v67_v49  ;;  %v18_v54 = vld [vmem:[%s694_s1 + $0x10] sm:$0xff]  ;;  %v65_v57 = vld [vmem:[%s694_s1 + $0x188] sm:$0xff]  ;;  %v32_v60 = vld [vmem:[%s694_s1 + $0x80] sm:$0xff]  ;;  %v85_v8 = vshrl.u32 %v84_v7, 7  ;;  %s336_s13 = sshll.u32 %s454_s12, 4  ;;  %s337_s13 = int_to_ptr.vmem [resolvable:$true] %s336_s13 }
  0x1d   :  { %v50_v55 = vld [vmem:[%s694_s1 + $0x110] sm:$0xff]  ;;  %370 = vmatpush3.msra.mxu0 %v19_v50  ;;  %405 = vmatpush3.msra.mxu1 %v51_v51  ;;  %v17_v58 = vld [vmem:[%s694_s1 + $0x8] sm:$0xff]  ;;  %v64_v61 = vld [vmem:[%s694_s1 + $0x180] sm:$0xff]  ;;  %s430_s14 = scalar_lea.vmem %s337_s13, 128  ;;  %p435_p1 = scmp.lt.s32.totalorder %s337_s13, %s337_s13 }
  0x1e   :  { %371 = vmatprep.subr.mxu0 %v34_v52  ;;  %406 = vmatprep.subr.mxu1 %v66_v53  ;;  %v49_v59 = vld [vmem:[%s694_s1 + $0x108] sm:$0xff]  ;;  %v16_v62 = vld [vmem:[%s694_s1] sm:$0xff]  ;;  %v15_v1 = vld [vmem:[%s693_s0 + $0x18] sm:$0xff]  ;;  %v86_v9 = vsub.s32 0, %v85_v8  ;;  %p431_p0 = scmp.ne.s32.totalorder %s337_s13, %s430_s14  ;;  %p436_p2 = scmp.lt.s32.totalorder %s430_s14, %s430_s14 }
  0x1f   :  { %372 = vmatpush3.msra.mxu0 %v18_v54  ;;  %407 = vmatpush3.msra.mxu1 %v50_v55  ;;  %v13_v63 = vld [vmem:[%s693_s0 + $0x8] sm:$0xff]  ;;  %v48_v0 = vld [vmem:[%s694_s1 + $0x100] sm:$0xff]  ;;  %v14_v3 = vld [vmem:[%s693_s0 + $0x10] sm:$0xff] }
  0x20   :  { %373 = vmatprep.subr.mxu0 %v33_v56  ;;  %408 = vmatprep.subr.mxu1 %v65_v57  ;;  %v12_v2 = vld [vmem:[%s693_s0] sm:$0xff]  ;;  %v81_v5 = vld [vmem:[%s694_s1 + $0x208] sm:$0xff]  ;;  %v82_v10 = vld [vmem:[%s694_s1 + $0x210] sm:$0xff]  ;;  %p437_p3 = por %p436_p2, %p435_p1 }
  0x21   :  { %374 = vmatpush3.msra.mxu0 %v17_v58  ;;  %409 = vmatpush3.msra.mxu1 %v49_v59  ;;  %v80_v6 = vld [vmem:[%s694_s1 + $0x200] sm:$0xff]  ;;  %v87_v13 = vrot.slane %v82_v10, %v86_v9  ;;  %v83_v42 = vld [vmem:[%s694_s1 + $0x218] sm:$0xff] }
  0x22   :  { %375 = vmatprep.subr.mxu0 %v32_v60  ;;  %410 = vmatprep.subr.mxu1 %v64_v61  ;;  %v255_v43 = vrot.slane %v83_v42, %v86_v9  ;;  %p438_p4 = pnand %p437_p3, %p431_p0 }
  0x23   :  { %376 = vmatpush3.msra.mxu0 %v16_v62  ;;  %152 = vmatprep.mubr.f32.mxu0 %v13_v63 }
  0x24   :  { %411 = vmatpush3.msra.mxu1 %v48_v0  ;;  %222 = vmatprep.mubr.f32.mxu1 %v15_v1 }
  0x25   :  { %153 = vmatmul.mubr.f32.vlgmr.msra.gmra.mxu0 %v12_v2  ;;  %223 = vmatmul.mubr.f32.vlgmr.msra.gmra.mxu1 %v14_v3 }
  0x26   :  { %418 = vmatprep.subr.mxu0 %v452_v4  ;;  %422 = vmatprep.mubr.msk.f32.mxu0 %vm453_vm0, %v452_v4 }
  0x27   :  { %419 = vmatpush3.msra.mxu0 %v81_v5 }
  0x28   :  { %420 = vmatprep.subr.mxu0 %v452_v4 }
  0x29   :  { %421 = vmatpush3.msra.mxu0 %v80_v6 }
  0xe5   :  { %v377_v11 = vpop.f32.mrf.mxu0  ;;  %v412_v12 = vpop.f32.mrf.mxu1 }
  0xe7   :  { %v378_v14 = vpop.f32.mrf.mxu0  ;;  %v413_v15 = vpop.f32.mrf.mxu1 }
  0xe8   :  { %v379_v16 = vadd.f32 %v378_v14, %v377_v11  ;;  %v414_v18 = vadd.f32 %v413_v15, %v412_v12 }
  0xea   :  { %v155_v17 = vadd.f32 %v379_v16, %v87_v13 }
  0xec   :  { %v225_v19 = vadd.f32 %v414_v18, %v155_v17 }
  0xee   :  { %v228_v20 = vmax.f32 %v225_v19, 0.0 }
  0xf0   :  { %v230_v21 = vsel %vm229_vm1, %v228_v20, 0.0 }
  0xf1   :  { %v231_v22 = vrot.slane %v230_v21, 4 }
  0xf3   :  { %v232_v23 = vadd.f32 %v231_v22, %v230_v21 }
  0xf5   :  { %v233_v24 = vrot.slane %v232_v23, 2 }
  0xf7   :  { %v234_v25 = vadd.f32 %v233_v24, %v232_v23 }
  0xf9   :  { %v235_v26 = vrot.slane %v234_v25, 1 }
  0xfb   :  { %v236_v27 = vadd.f32 %v235_v26, %v234_v25 }
  0xfd   :  { %v238_v28 = vmul.f32 0.125, %v236_v27 }
  0xff   :  { %v239_v29 = vsub.f32 %v228_v20, %v238_v28 }
 0x101   :  { %v240_v30 = vmul.f32 %v239_v29, %v239_v29 }
 0x103   :  { %v241_v31 = vsel %vm229_vm1, %v240_v30, 0.0 }
 0x104   :  { %v242_v32 = vrot.slane %v241_v31, 4 }
 0x106   :  { %v243_v33 = vadd.f32 %v242_v32, %v241_v31 }
 0x108   :  { %v244_v34 = vrot.slane %v243_v33, 2 }
 0x10a   :  { %v245_v35 = vadd.f32 %v244_v34, %v243_v33 }
 0x10c   :  { %v246_v36 = vrot.slane %v245_v35, 1 }
 0x10e   :  { %v247_v37 = vadd.f32 %v246_v36, %v245_v35 }
 0x110   :  { %v248_v38 = vmul.f32 0.125, %v247_v37 }
 0x112   :  { %v249_v39 = vadd.f32 1e-05, %v248_v38 }
 0x114   :  { %428 = vrsqrt.f32 %v249_v39 }
 0x121   :  { %v429_v40 = vpop.eup %428 }
 0x122   :  { %v251_v41 = vmul.f32 %v429_v40, %v239_v29 }
 0x124   :  { %423 = vmatmul.mubr.msk.f32.vlgmr.msra.gmra.mxu0 %vm229_vm1, %v251_v41 }
 0x1e4   :  { %v325_v44 = vpop.f32.mrf.mxu0 }
 0x1e5   :  { %v326_v45 = vadd.f32 %v325_v44, %v255_v43 }
 0x1e6   :  { %v424_v46 = vpop.f32.mrf.mxu0 }
 0x1e7   :  { %329 = vst.msk [vmem:[#allocation2] sm:$0xff] %vm229_vm1, %v326_v45 }
 0x1e8   :  { %441 = shalt.err (!%p438_p4)
}
 0x1e9   :  { %339 = dma.vmem_to_hbm [thread:$0]  %s337_s13, 128, %s695_s2, [#allocation3]  }
 0x1ea   :  { %450 = dma.done.wait [#allocation3], 128  }
 0x1eb   :  { %451 = vsyncadd [#allocation3], 4294967168 }
 0x1ec   :  { %343 = vsyncpa [#allocation3], 1 }

</bundles_post_ra>
